<compile_context>
chip_gen: v5e
topology: v5e:2x2
jax: 0.10.0
libtpu: 0.0.40
codegen_flags: <defaults>
</compile_context>

<pallas_src>
import jax
import jax.numpy as jnp
import numpy as np
from jax.experimental import pallas as pl
from jax.experimental.pallas import tpu as pltpu

IOU_THRESHOLD = 0.7


def _pair_suppress(bi, bkt):
    """bi: (TILE, 4) suppressor rows; bkt: (4, TILE) candidate coord planes.
    Returns (TILE, TILE) bool: True where suppressor i suppresses candidate k.
    Divide-free and union-free:
        IoU > thr  <=>  inter > thr*(area_i + area_k - inter)
                   <=>  inter*(1+thr) > thr*area_i + thr*area_k
    (thr*area terms are computed on the (TILE,1)/(1,TILE) shapes before
    broadcasting, trimming the per-element VALU work)."""
    y1_i, x1_i, y2_i, x2_i = bi[:, 0:1], bi[:, 1:2], bi[:, 2:3], bi[:, 3:4]
    y1_k, x1_k, y2_k, x2_k = bkt[0:1, :], bkt[1:2, :], bkt[2:3, :], bkt[3:4, :]

    thr_area_i = IOU_THRESHOLD * ((y2_i - y1_i) * (x2_i - x1_i))   # (TILE, 1)
    thr_area_k = IOU_THRESHOLD * ((y2_k - y1_k) * (x2_k - x1_k))   # (1, TILE)

    iy1 = jnp.maximum(y1_i, y1_k)                                  # (TILE, TILE)
    ix1 = jnp.maximum(x1_i, x1_k)
    iy2 = jnp.minimum(y2_i, y2_k)
    ix2 = jnp.minimum(x2_i, x2_k)
    inter = jnp.maximum(iy2 - iy1, 0.0) * jnp.maximum(ix2 - ix1, 0.0)
    return inter * (1.0 + IOU_THRESHOLD) > thr_area_i + thr_area_k


def _nms_keep_kernel(k_tbl_ref, i_tbl_ref, sup_ref, cand_ref, keep_ref):
    """One triangular-schedule step.
    k_tbl/i_tbl: (rows, steps) SMEM tables of (candidate, suppressor) block
    indices, k-major per row so keep_ref stays resident across each k-run.
    sup_ref: (TILE, 4) suppressor rows, cand_ref: (4, TILE) candidate planes,
    keep_ref: (1, TILE) int32 keep mask (resident over a k-run)."""
    c = pl.program_id(0)        # schedule row (shards across cores on v7x)
    s = pl.program_id(1)        # step within the row's triangular schedule
    k_blk = k_tbl_ref[c, s]     # candidate tile (output block)
    i_blk = i_tbl_ref[c, s]     # suppressor tile (i_blk <= k_blk always)

    @pl.when(i_blk == 0)
    def _init():
        keep_ref[...] = jnp.ones_like(keep_ref)

    sup = _pair_suppress(sup_ref[...], cand_ref[...])
    # Off-diagonal blocks (i < k): every suppressor index < every candidate
    # index.  Diagonal block (i == k): tile-local row < col is exact because
    # TILE_I == TILE_K, so global block offsets cancel.
    row = jax.lax.broadcasted_iota(jnp.int32, sup.shape, 0)
    col = jax.lax.broadcasted_iota(jnp.int32, sup.shape, 1)
    earlier = jnp.logical_or(i_blk < k_blk, row < col)
    hit = jnp.any(jnp.logical_and(sup, earlier), axis=0, keepdims=True)
    keep_ref[...] = jnp.where(hit, 0, keep_ref[...])


def _build_schedule(num_tiles, num_rows):
    """Upper-triangular (k_blk, i_blk) schedule split round-robin over
    `num_rows` rows (the row axis is marked 'parallel' so megacore parts
    shard it).  Each row lists its candidate tiles k-major with i = 0..k and
    is padded to the longest row by repeating its last pair: replays are
    idempotent under OR-accumulation, and the only pair that can re-trigger
    the i == 0 init is (0, 0), whose full recompute is still exact."""
    rows_k, rows_i = [], []
    for c in range(num_rows):
        ks, iss = [], []
        for k in range(c, num_tiles, num_rows):
            for i in range(k + 1):
                ks.append(k)
                iss.append(i)
        rows_k.append(ks)
        rows_i.append(iss)
    steps = max(len(r) for r in rows_k)
    for c in range(num_rows):
        pad = steps - len(rows_k[c])
        rows_k[c] = rows_k[c] + [rows_k[c][-1]] * pad
        rows_i[c] = rows_i[c] + [rows_i[c][-1]] * pad
    return (jnp.asarray(rows_k, jnp.int32),
            jnp.asarray(rows_i, jnp.int32),
            steps)


def nms_keep_mask(bbox_sorted, *, tile=None):
    """bbox_sorted: (N, 4) f32, score-descending. Returns (N,) int32 keep mask."""
    n = bbox_sorted.shape[0]
    if tile is None:
        # Smallest lane-dense tile that covers tiny N in one block; cap at 512
        # so (TILE, TILE) f32 intermediates (1 MiB each) fit the scoped-VMEM
        # defaults on v5e (16 MiB) / v6e / v7x (32 MiB) without raising limits.
        # (v6e could take tile=1024 with vmem_limit_bytes bumped; not needed
        #  here and unsafe to copy blindly onto v7x's 64 MiB part.)
        tile = min(512, pl.cdiv(n, 128) * 128)
    n_pad = pl.cdiv(n, tile) * tile
    num_tiles = n_pad // tile
    num_rows = min(2, num_tiles)          # 2 rows -> megacore sharding on v7x

    k_tbl, i_tbl, steps = _build_schedule(num_tiles, num_rows)

    # Pad with degenerate zero-area boxes at the end: their intersection with
    # anything is 0, so 0*(1+thr) > thr*area_k never holds -> padded rows can
    # never suppress, and padded candidate lanes are sliced off on return.
    boxes = jnp.zeros((n_pad, 4), jnp.float32).at[:n].set(
        bbox_sorted.astype(jnp.float32))
    boxes_t = boxes.T                                     # (4, n_pad) lane-dense

    keep = pl.pallas_call(
        _nms_keep_kernel,
        out_shape=jax.ShapeDtypeStruct((1, n_pad), jnp.int32),
        grid_spec=pltpu.PrefetchScalarGridSpec(
            num_scalar_prefetch=2,                        # k_tbl, i_tbl -> SMEM
            grid=(num_rows, steps),
            in_specs=[
                # suppressor rows (i_blk tile of (N_pad, 4))
                pl.BlockSpec((tile, 4), lambda c, s, kt, it: (it[c, s], 0)),
                # candidate coordinate planes (k_blk tile of (4, N_pad))
                pl.BlockSpec((4, tile), lambda c, s, kt, it: (0, kt[c, s])),
            ],
            # keep mask block: resident across each k-run (k-major schedule)
            out_specs=pl.BlockSpec((1, tile), lambda c, s, kt, it: (0, kt[c, s])),
        ),
        compiler_params=pltpu.CompilerParams(
            dimension_semantics=("parallel", "arbitrary")),
    )(k_tbl, i_tbl, boxes, boxes_t)
    return keep[0, :n]


def nms(bounding_box, cls_score):
    """bounding_box: (1, N, 4), cls_score: (1, N). Returns (bbox_sorted, keep)."""
    bbox = bounding_box[0]                    # (N, 4)
    score = cls_score[0]                      # (N,)
    idx = jnp.argsort(-score)                 # descending sort (glue, plain JAX)
    bbox_sorted = bbox[idx]
    keep = nms_keep_mask(bbox_sorted)
    return bbox_sorted, keep.astype(bool)


def _reference_nms_keep(bbox_sorted_np, thr=IOU_THRESHOLD):
    """Direct numpy transcription of the PyTorch loop (after sorting)."""
    n = bbox_sorted_np.shape[0]
    keep = [True] * n

    def ious(boxes, box):
        y1 = np.maximum(boxes[:, 0], box[0]); x1 = np.maximum(boxes[:, 1], box[1])
        y2 = np.minimum(boxes[:, 2], box[2]); x2 = np.minimum(boxes[:, 3], box[3])
        inter = np.maximum(y2 - y1, 0.0) * np.maximum(x2 - x1, 0.0)
        a1 = (boxes[:, 2] - boxes[:, 0]) * (boxes[:, 3] - boxes[:, 1])
        a2 = (box[2] - box[0]) * (box[3] - box[1])
        return inter / np.maximum(a1 + a2 - inter, 1e-12)

    for i in range(n - 1):
        for j, iou in enumerate(ious(bbox_sorted_np[i + 1:], bbox_sorted_np[i])):
            if iou > thr:
                keep[i + j + 1] = False
    return np.asarray(keep)


if __name__ == "__main__":
    key = jax.random.PRNGKey(0)
    k1, k2, k3 = jax.random.split(key, 3)

    num_rois = 8
    # Well-formed boxes: (y1, x1) in [0, 10), sides in [2, 8) -> (y2, x2).
    yx1 = jax.random.uniform(k1, (1, num_rois, 2), jnp.float32, 0.0, 10.0)
    hw = jax.random.uniform(k2, (1, num_rois, 2), jnp.float32, 2.0, 8.0)
    bounding_box = jnp.concatenate([yx1, yx1 + hw], axis=-1)     # (1, N, 4)
    cls_score = jax.random.uniform(k3, (1, num_rois), jnp.float32)

    bbox_sorted, keep = nms(bounding_box, cls_score)
    jax.block_until_ready((bbox_sorted, keep))

    # Cross-check against a numpy transcription of the PyTorch double loop.
    ref_keep = _reference_nms_keep(np.asarray(bbox_sorted))
    np.testing.assert_array_equal(np.asarray(keep), ref_keep)

    # Multi-tile configuration exercising the 2-row triangular schedule with
    # several k-runs per row and schedule padding (N=320, tile=128 -> 3 tiles).
    n_big = 320
    kb1, kb2, kb3 = jax.random.split(jax.random.PRNGKey(1), 3)
    yx1b = jax.random.uniform(kb1, (1, n_big, 2), jnp.float32, 0.0, 30.0)
    hwb = jax.random.uniform(kb2, (1, n_big, 2), jnp.float32, 2.0, 12.0)
    bb_big = jnp.concatenate([yx1b, yx1b + hwb], axis=-1)
    sc_big = jax.random.uniform(kb3, (1, n_big), jnp.float32)
    bbox_big = bb_big[0][jnp.argsort(-sc_big[0])]
    keep_big = nms_keep_mask(bbox_big, tile=128)
    jax.block_until_ready(keep_big)
    np.testing.assert_array_equal(
        np.asarray(keep_big).astype(bool), _reference_nms_keep(np.asarray(bbox_big)))

    # Final dynamic-shape gather (bbox[keep]) done eagerly on host, since
    # variable-length outputs cannot live inside a TPU kernel / jit.
    bbox_keep = bbox_sorted[keep]            # (num_kept, 4)
    jax.block_until_ready(bbox_keep)

    print("KERNEL_OK")
</pallas_src>

<mosaic_0001>
module attributes {stable_mosaic.version = 11 : i64} {
  func.func @_nms_keep_kernel(%arg0: i32, %arg1: i32, %arg2: memref<1x1xi32, #tpu.memory_space<smem>>, %arg3: memref<1x1xi32, #tpu.memory_space<smem>>, %arg4: memref<128x4xf32, #tpu.memory_space<vmem>>, %arg5: memref<4x128xf32, #tpu.memory_space<vmem>>, %arg6: memref<1x128xi32, #tpu.memory_space<vmem>>) attributes {dimension_semantics = [#tpu.dimension_semantics<parallel>, #tpu.dimension_semantics<arbitrary>], iteration_bounds = array<i64: 1, 1>, scalar_prefetch = 2 : i64, scratch_operands = 0 : i64, tpu.core_type = #tpu.core_type<tc>, window_params = [{transform_indices = @transform_0, window_bounds = array<i64: 128, 4>}, {transform_indices = @transform_1, window_bounds = array<i64: 4, 128>}, {transform_indices = @transform_2, window_bounds = array<i64: 1, 128>}]} {
    %0 = arith.index_cast %arg0 : i32 to index
    %1 = arith.index_cast %arg1 : i32 to index
    %2 = memref.load %arg2[%0, %1] : memref<1x1xi32, #tpu.memory_space<smem>>
    %3 = arith.index_cast %arg0 : i32 to index
    %4 = arith.index_cast %arg1 : i32 to index
    %5 = memref.load %arg3[%3, %4] : memref<1x1xi32, #tpu.memory_space<smem>>
    %c0_i32 = arith.constant 0 : i32
    %6 = arith.cmpi eq, %5, %c0_i32 : i32
    %7 = arith.extui %6 : i1 to i32
    %c0_i32_0 = arith.constant 0 : i32
    %8 = arith.cmpi ne, %7, %c0_i32_0 : i32
    scf.if %8 {
      %c1_i32 = arith.constant 1 : i32
      %72 = vector.broadcast %c1_i32 : i32 to vector<1x128xi32>
      %c0_17 = arith.constant 0 : index
      %c0_18 = arith.constant 0 : index
      %73 = vector.load %arg6[%c0_17, %c0_18] : memref<1x128xi32, #tpu.memory_space<vmem>>, vector<1x128xi32>
      tpu.vector_store %arg6[%c0_17, %c0_18], %72 {strides = array<i32>} : memref<1x128xi32, #tpu.memory_space<vmem>>, vector<1x128xi32>,
    } else {
    }
    %c0 = arith.constant 0 : index
    %c0_1 = arith.constant 0 : index
    %9 = vector.load %arg4[%c0, %c0_1] : memref<128x4xf32, #tpu.memory_space<vmem>>, vector<128x4xf32>
    %c0_2 = arith.constant 0 : index
    %c0_3 = arith.constant 0 : index
    %10 = vector.load %arg5[%c0_2, %c0_3] : memref<4x128xf32, #tpu.memory_space<vmem>>, vector<4x128xf32>
    %11 = vector.extract_strided_slice %9 {offsets = [0, 0], sizes = [128, 1], strides = [1, 1]} : vector<128x4xf32> to vector<128x1xf32>
    %12 = vector.extract_strided_slice %9 {offsets = [0, 1], sizes = [128, 1], strides = [1, 1]} : vector<128x4xf32> to vector<128x1xf32>
    %13 = vector.extract_strided_slice %9 {offsets = [0, 2], sizes = [128, 1], strides = [1, 1]} : vector<128x4xf32> to vector<128x1xf32>
    %14 = vector.extract_strided_slice %9 {offsets = [0, 3], sizes = [128, 1], strides = [1, 1]} : vector<128x4xf32> to vector<128x1xf32>
    %15 = vector.extract_strided_slice %10 {offsets = [0, 0], sizes = [1, 128], strides = [1, 1]} : vector<4x128xf32> to vector<1x128xf32>
    %16 = vector.extract_strided_slice %10 {offsets = [1, 0], sizes = [1, 128], strides = [1, 1]} : vector<4x128xf32> to vector<1x128xf32>
    %17 = vector.extract_strided_slice %10 {offsets = [2, 0], sizes = [1, 128], strides = [1, 1]} : vector<4x128xf32> to vector<1x128xf32>
    %18 = vector.extract_strided_slice %10 {offsets = [3, 0], sizes = [1, 128], strides = [1, 1]} : vector<4x128xf32> to vector<1x128xf32>
    %19 = arith.subf %13, %11 : vector<128x1xf32>
    %20 = arith.subf %14, %12 : vector<128x1xf32>
    %21 = arith.mulf %19, %20 : vector<128x1xf32>
    %cst = arith.constant 0.699999988 : f32
    %22 = vector.broadcast %cst : f32 to vector<128x1xf32>
    %23 = arith.mulf %22, %21 : vector<128x1xf32>
    %24 = arith.subf %17, %15 : vector<1x128xf32>
    %25 = arith.subf %18, %16 : vector<1x128xf32>
    %26 = arith.mulf %24, %25 : vector<1x128xf32>
    %cst_4 = arith.constant 0.699999988 : f32
    %27 = vector.broadcast %cst_4 : f32 to vector<1x128xf32>
    %28 = arith.mulf %27, %26 : vector<1x128xf32>
    %29 = vector.broadcast %11 : vector<128x1xf32> to vector<128x128xf32>
    %30 = vector.broadcast %15 : vector<1x128xf32> to vector<128x128xf32>
    %31 = arith.maximumf %29, %30 : vector<128x128xf32>
    %32 = vector.broadcast %12 : vector<128x1xf32> to vector<128x128xf32>
    %33 = vector.broadcast %16 : vector<1x128xf32> to vector<128x128xf32>
    %34 = arith.maximumf %32, %33 : vector<128x128xf32>
    %35 = vector.broadcast %13 : vector<128x1xf32> to vector<128x128xf32>
    %36 = vector.broadcast %17 : vector<1x128xf32> to vector<128x128xf32>
    %37 = arith.minimumf %35, %36 : vector<128x128xf32>
    %38 = vector.broadcast %14 : vector<128x1xf32> to vector<128x128xf32>
    %39 = vector.broadcast %18 : vector<1x128xf32> to vector<128x128xf32>
    %40 = arith.minimumf %38, %39 : vector<128x128xf32>
    %41 = arith.subf %37, %31 : vector<128x128xf32>
    %cst_5 = arith.constant 0.000000e+00 : f32
    %42 = vector.broadcast %cst_5 : f32 to vector<128x128xf32>
    %43 = arith.maximumf %41, %42 : vector<128x128xf32>
    %44 = arith.subf %40, %34 : vector<128x128xf32>
    %cst_6 = arith.constant 0.000000e+00 : f32
    %45 = vector.broadcast %cst_6 : f32 to vector<128x128xf32>
    %46 = arith.maximumf %44, %45 : vector<128x128xf32>
    %47 = arith.mulf %43, %46 : vector<128x128xf32>
    %cst_7 = arith.constant 1.700000e+00 : f32
    %48 = vector.broadcast %cst_7 : f32 to vector<128x128xf32>
    %49 = arith.mulf %47, %48 : vector<128x128xf32>
    %50 = vector.broadcast %23 : vector<128x1xf32> to vector<128x128xf32>
    %51 = vector.broadcast %28 : vector<1x128xf32> to vector<128x128xf32>
    %52 = arith.addf %50, %51 : vector<128x128xf32>
    %53 = arith.cmpf ogt, %49, %52 : vector<128x128xf32>
    %54 = tpu.iota {dimensions = array<i32: 0>} : vector<128x128xi32>
    %55 = tpu.iota {dimensions = array<i32: 1>} : vector<128x128xi32>
    %56 = arith.cmpi slt, %5, %2 : i32
    %57 = arith.cmpi slt, %54, %55 : vector<128x128xi32>
    %58 = vector.broadcast %56 : i1 to vector<128x128xi1>
    %59 = arith.ori %58, %57 : vector<128x128xi1>
    %60 = arith.andi %53, %59 : vector<128x128xi1>
    %cst_8 = arith.constant 1.000000e+00 : f32
    %cst_9 = arith.constant 0.000000e+00 : f32
    %61 = vector.broadcast %cst_8 : f32 to vector<128x128xf32>
    %62 = vector.broadcast %cst_9 : f32 to vector<128x128xf32>
    %63 = arith.select %60, %61, %62 : vector<128x128xi1>, vector<128x128xf32>
    %cst_10 = arith.constant dense<0xFF800000> : vector<128xf32>
    %64 = vector.multi_reduction <maximumf>, %63, %cst_10 [0] : vector<128x128xf32> to vector<128xf32>
    %cst_11 = arith.constant 0.000000e+00 : f32
    %65 = vector.broadcast %cst_11 : f32 to vector<128xf32>
    %66 = arith.cmpf ogt, %64, %65 : vector<128xf32>
    %67 = vector.shape_cast %66 : vector<128xi1> to vector<1x128xi1>
    %c0_12 = arith.constant 0 : index
    %c0_13 = arith.constant 0 : index
    %68 = vector.load %arg6[%c0_12, %c0_13] : memref<1x128xi32, #tpu.memory_space<vmem>>, vector<1x128xi32>
    %c0_i32_14 = arith.constant 0 : i32
    %69 = vector.broadcast %c0_i32_14 : i32 to vector<1x128xi32>
    %70 = arith.select %67, %69, %68 : vector<1x128xi1>, vector<1x128xi32>
    %c0_15 = arith.constant 0 : index
    %c0_16 = arith.constant 0 : index
    %71 = vector.load %arg6[%c0_15, %c0_16] : memref<1x128xi32, #tpu.memory_space<vmem>>, vector<1x128xi32>
    tpu.vector_store %arg6[%c0_15, %c0_16], %70 {strides = array<i32>} : memref<1x128xi32, #tpu.memory_space<vmem>>, vector<1x128xi32>,
    return
  }
  func.func @transform_0(%arg0: i32, %arg1: i32, %arg2: memref<1x1xi32, #tpu.memory_space<smem>>, %arg3: memref<1x1xi32, #tpu.memory_space<smem>>) -> (i32, i32) {
    %0 = arith.index_cast %arg0 : i32 to index
    %1 = arith.index_cast %arg1 : i32 to index
    %2 = memref.load %arg3[%0, %1] : memref<1x1xi32, #tpu.memory_space<smem>>
    %c0_i32 = arith.constant 0 : i32
    %c0_i32_0 = arith.constant 0 : i32
    return %2, %c0_i32 : i32, i32
  }
  func.func @transform_1(%arg0: i32, %arg1: i32, %arg2: memref<1x1xi32, #tpu.memory_space<smem>>, %arg3: memref<1x1xi32, #tpu.memory_space<smem>>) -> (i32, i32) {
    %0 = arith.index_cast %arg0 : i32 to index
    %1 = arith.index_cast %arg1 : i32 to index
    %2 = memref.load %arg2[%0, %1] : memref<1x1xi32, #tpu.memory_space<smem>>
    %c0_i32 = arith.constant 0 : i32
    %c0_i32_0 = arith.constant 0 : i32
    return %c0_i32, %2 : i32, i32
  }
  func.func @transform_2(%arg0: i32, %arg1: i32, %arg2: memref<1x1xi32, #tpu.memory_space<smem>>, %arg3: memref<1x1xi32, #tpu.memory_space<smem>>) -> (i32, i32) {
    %0 = arith.index_cast %arg0 : i32 to index
    %1 = arith.index_cast %arg1 : i32 to index
    %2 = memref.load %arg2[%0, %1] : memref<1x1xi32, #tpu.memory_space<smem>>
    %c0_i32 = arith.constant 0 : i32
    %c0_i32_0 = arith.constant 0 : i32
    return %c0_i32, %2 : i32, i32
  }
}

</mosaic_0001>

<bundles_post_ra>
// kernel: tpu_custom_call.1
= control target key start
LH: loop header
LB: loop body
LE: loop exit
PB: predicated region body
PF: predicated region fallthrough
CT: control target
= control target key end

     0   :  { %s1765_s0 = inlined_call_operand.<no memory space> [shape: s32[1,1], index: 0, kind: input, shape index: {}]   ;;  %s1766_s1 = inlined_call_operand.<no memory space> [shape: s32[1,1], index: 1, kind: input, shape index: {}]   ;;  %s1767_s2 = inlined_call_operand.vmem [shape: f32[128,4], index: 2, kind: input, shape index: {}]   ;;  %s1768_s3 = inlined_call_operand.vmem [shape: f32[4,128], index: 3, kind: input, shape index: {}]   ;;  %s1769_s4 = inlined_call_operand.hbm [shape: s32[1,128], index: 4, kind: output, shape index: {}]  }
   0x1   :  { %9 = sst [smem:[#allocation3]] %s1765_s0 }
   0x2   :  { %11 = vsyncpa [#allocation6], 0  ;;  %s980_s19 = sshll.u32 %s1766_s1, 4  ;;  %s1073_s20 = sld [smem:[#allocation3]] }
   0x3   :  { %p64_p0 = scmp.lt.s32.totalorder %s980_s19, 15  ;;  %p983_p2 = scmp.ne.s32.totalorder %s1766_s1, 0 }
   0x5   :  { %s1784_s19 = smov (!%p64_p0, %s980_s19), 15 }
   0x6   :  { %s981_s21 = sshll.u32 %s1784_s19, 3 }
   0x7   :  { %s1078_s24 = scalar_lea.vmem %s1767_s2, %s981_s21 }
   0x8   :  { %p77_p1 = scmp.lt.s32.totalorder %s1073_s20, 0 }
   0x9   :  { %97 = sbr.rel (%p983_p2) target bundleno = 16 (0x10), region = 13 }
   0xa   :  { %s78_s25 = scalar_select %p77_p1, %s1073_s20, 0 }
   0xc   :  { %s982_s0 = sshll.u32 %s78_s25, 2 }
   0xd   :  { %s1085_s28 = scalar_lea.vmem %s1768_s3, %s982_s0 }
   0xe   :  { %v1033_v0 = vmov 1  }
   0xf   :  { %98 = vst [vmem:[#allocation5] sm:$0x1] %v1033_v0 }
  0x10 PF:  { %v1091_v1 = vld [vmem:[%s1078_s24 + $0x10] sm:$0xff]  ;;  %v1094_v2 = vld [vmem:[%s1078_s24] sm:$0xff]  ;;  %s1034_s2 = smov 2   ;;  %v1106_v4 = vld [vmem:[%s1078_s24 + $0x18] sm:$0xff]  ;;  %v1035_v7 = vmov 0   ;;  %s1036_s3 = smov 127  }
  0x11   :  { %136 = vrot.lane.b32.xlu1 %v1091_v1, %s1034_s2  ;;  %132 = vrot.lane.b32.xlu0 %v1094_v2, %s1034_s2  ;;  %v1101_v3 = vld [vmem:[%s1078_s24 + $0x20] sm:$0xff]  ;;  %v1109_v5 = vld [vmem:[%s1078_s24 + $0x8] sm:$0xff]  ;;  %v1037_v51 = vmov 1   ;;  %v1038_v58 = vmov 3   ;;  %p853_p3 = scmp.lt.s32.totalorder %s1766_s1, %s1073_s20  ;;  %s951_s1 = sld [smem:[#allocation3]] }
  0x12   :  { %140 = vrot.lane.b32.xlu2 %v1101_v3, %s1034_s2  ;;  %v1112_v6 = vld [vmem:[%s1078_s24 + $0x28] sm:$0xff]  ;;  %995 = vset.pattern.permute.xlu1 %v1035_v7  ;;  %v1121_v8 = vld [vmem:[%s1078_s24 + $0x30] sm:$0xff]  ;;  %v1124_v9 = vld [vmem:[%s1078_s24 + $0x38] sm:$0xff]  ;;  %s1041_s11 = smov [#allocation5]   ;;  %s1023_s18 = scalar_lea.hbm %s1769_s4, 1 }
  0x13   :  { %993 = vset.pattern.permute.xlu2 %v1035_v7  ;;  %994 = vset.pattern.permute.xlu0 %v1035_v7  ;;  %v1127_v10 = vld [vmem:[%s1078_s24 + $0x40] sm:$0xff]  ;;  %v1136_v11 = vld [vmem:[%s1078_s24 + $0x48] sm:$0xff]  ;;  %v1139_v12 = vld [vmem:[%s1078_s24 + $0x50] sm:$0xff]  ;;  %v1770_v7 = vmov 2   ;;  %s870_s7 = scalar_select %p853_p3, 1, 0 }
  0x14   :  { %v1142_v13 = vld [vmem:[%s1078_s24 + $0x58] sm:$0xff]  ;;  %v1151_v14 = vld [vmem:[%s1078_s24 + $0x60] sm:$0xff]  ;;  %v1154_v15 = vld [vmem:[%s1078_s24 + $0x68] sm:$0xff]  ;;  %s956_s12 = sshll.u32 %s1041_s11, 4  ;;  %s957_s12 = int_to_ptr.vmem [resolvable:$true] %s956_s12 }
  0x15   :  { %v1157_v16 = vld [vmem:[%s1078_s24 + $0x70] sm:$0xff]  ;;  %v1166_v17 = vld [vmem:[%s1078_s24 + $0x78] sm:$0xff] }
  0x17   :  { %s954_s10 = scalar_lea.hbm %s1769_s4, %s951_s1 }
  0x18   :  { %s958_s13 = sshll.u32 %s954_s10, 4  ;;  %s959_s13 = int_to_ptr.hbm [resolvable:$true] %s958_s13 }
  0x19   :  { %138 = vrot.lane.b32.xlu1 %v1106_v4, %s1034_s2  ;;  %134 = vrot.lane.b32.xlu0 %v1109_v5, %s1034_s2  ;;  %s1019_s14 = sshra.s32 %s959_s13, 4  ;;  %s1020_s14 = int_to_ptr.hbm [resolvable:$true] %s1019_s14 }
  0x1a   :  { %142 = vrot.lane.b32.xlu2 %v1112_v6, %s1034_s2  ;;  %s1021_s15 = scalar_lea.hbm %s1020_s14, 1  ;;  %p1024_p5 = scmp.lt.s32.totalorder %s1020_s14, %s1769_s4 }
  0x1b   :  { %p1022_p4 = scmp.ne.s32.totalorder %s1020_s14, %s1021_s15  ;;  %p1025_p6 = scmp.lt.s32.totalorder %s1023_s18, %s1021_s15 }
  0x1d   :  { %p1026_p7 = por %p1025_p6, %p1024_p5 }
  0x1f   :  { %p1027_p8 = pnand %p1026_p7, %p1022_p4 }
  0x21   :  { %144 = vrot.lane.b32.xlu0 %v1121_v8, %s1034_s2  ;;  %146 = vrot.lane.b32.xlu1 %v1124_v9, %s1034_s2 }
  0x22   :  { %148 = vrot.lane.b32.xlu2 %v1127_v10, %s1034_s2 }
  0x29   :  { %150 = vrot.lane.b32.xlu0 %v1136_v11, %s1034_s2  ;;  %152 = vrot.lane.b32.xlu1 %v1139_v12, %s1034_s2 }
  0x2a   :  { %154 = vrot.lane.b32.xlu2 %v1142_v13, %s1034_s2 }
  0x31   :  { %156 = vrot.lane.b32.xlu0 %v1151_v14, %s1034_s2  ;;  %158 = vrot.lane.b32.xlu1 %v1154_v15, %s1034_s2 }
  0x32   :  { %160 = vrot.lane.b32.xlu2 %v1157_v16, %s1034_s2 }
  0x39   :  { %162 = vrot.lane.b32.xlu0 %v1166_v17, %s1034_s2  ;;  %310 = vperm.xlu1 %995, %v1091_v1  }
  0x3a   :  { %302 = vperm.xlu2 %993, %v1094_v2  }
  0x41   :  { %318 = vperm.xlu1 %995, %v1101_v3   ;;  %306 = vperm.xlu0 %994, %v1109_v5  }
  0x42   :  { %314 = vperm.xlu2 %993, %v1106_v4  }
  0x49   :  { %330 = vperm.xlu1 %995, %v1124_v9   ;;  %326 = vperm.xlu0 %994, %v1121_v8  }
  0x4a   :  { %322 = vperm.xlu2 %993, %v1112_v6  }
  0x51   :  { %342 = vperm.xlu1 %995, %v1139_v12   ;;  %338 = vperm.xlu0 %994, %v1136_v11  }
  0x52   :  { %334 = vperm.xlu2 %993, %v1127_v10  }
  0x5a   :  { %346 = vperm.xlu2 %993, %v1142_v13  }
  0x6c   :  { %v141_v18 = vpop.permute.xlu2 %140 }
  0x6d   :  { %v1211_v31 = vsub.f32 %v1101_v3, %v141_v18 }
  0x74   :  { %v143_v19 = vpop.permute.xlu2 %142 }
  0x75   :  { %v1193_v24 = vsub.f32 %v1112_v6, %v143_v19 }
  0x7c   :  { %v149_v25 = vpop.permute.xlu2 %148 }
  0x7d   :  { %v1208_v30 = vsub.f32 %v1127_v10, %v149_v25 }
  0x83   :  { %v137_v20 = vpop.permute.xlu1 %136  ;;  %v133_v21 = vpop.permute.xlu0 %132 }
  0x84   :  { %v1183_v22 = vsub.f32 %v1091_v1, %v137_v20  ;;  %v1186_v23 = vsub.f32 %v1094_v2, %v133_v21  ;;  %v155_v35 = vpop.permute.xlu2 %154 }
  0x85   :  { %v1223_v36 = vsub.f32 %v1142_v13, %v155_v35 }
  0x86   :  { %216 = vrot.lane.b32.xlu0 %v1183_v22, %s1036_s3  ;;  %212 = vrot.lane.b32.xlu1 %v1186_v23, %s1036_s3 }
  0x8b   :  { %v139_v26 = vpop.permute.xlu1 %138  ;;  %v135_v27 = vpop.permute.xlu0 %134 }
  0x8c   :  { %v1196_v28 = vsub.f32 %v1106_v4, %v139_v26  ;;  %v1199_v29 = vsub.f32 %v1109_v5, %v135_v27  ;;  %v161_v41 = vpop.permute.xlu2 %160 }
  0x8d   :  { %v1238_v42 = vsub.f32 %v1157_v16, %v161_v41 }
  0x8e   :  { %222 = vrot.lane.b32.xlu0 %v1193_v24, %s1036_s3  ;;  %218 = vrot.lane.b32.xlu1 %v1196_v28, %s1036_s3 }
  0x8f   :  { %214 = vrot.lane.b32.xlu2 %v1199_v29, %s1036_s3 }
  0x93   :  { %v145_v32 = vpop.permute.xlu0 %144  ;;  %v147_v34 = vpop.permute.xlu1 %146 }
  0x94   :  { %v1214_v33 = vsub.f32 %v1121_v8, %v145_v32  ;;  %v1226_v37 = vsub.f32 %v1124_v9, %v147_v34  ;;  %v1266_v50 = vpop.permute.xlu2 %302 }
  0x96   :  { %228 = vrot.lane.b32.xlu0 %v1208_v30, %s1036_s3  ;;  %224 = vrot.lane.b32.xlu1 %v1214_v33, %s1036_s3 }
  0x97   :  { %220 = vrot.lane.b32.xlu2 %v1211_v31, %s1036_s3 }
  0x9b   :  { %v151_v38 = vpop.permute.xlu0 %150  ;;  %v153_v40 = vpop.permute.xlu1 %152 }
  0x9c   :  { %v1229_v39 = vsub.f32 %v1136_v11, %v151_v38  ;;  %v1241_v43 = vsub.f32 %v1139_v12, %v153_v40  ;;  %v1271_v52 = vpop.permute.xlu2 %314 }
  0x9e   :  { %234 = vrot.lane.b32.xlu0 %v1223_v36, %s1036_s3  ;;  %230 = vrot.lane.b32.xlu1 %v1229_v39, %s1036_s3 }
  0x9f   :  { %226 = vrot.lane.b32.xlu2 %v1226_v37, %s1036_s3 }
  0xa3   :  { %v157_v44 = vpop.permute.xlu0 %156  ;;  %v159_v46 = vpop.permute.xlu1 %158 }
  0xa4   :  { %v1244_v45 = vsub.f32 %v1151_v14, %v157_v44  ;;  %v1253_v47 = vsub.f32 %v1154_v15, %v159_v46  ;;  %v1276_v53 = vpop.permute.xlu2 %322 }
  0xa6   :  { %240 = vrot.lane.b32.xlu0 %v1238_v42, %s1036_s3  ;;  %236 = vrot.lane.b32.xlu1 %v1244_v45, %s1036_s3 }
  0xa7   :  { %232 = vrot.lane.b32.xlu2 %v1241_v43, %s1036_s3 }
  0xab   :  { %v163_v48 = vpop.permute.xlu0 %162  ;;  %v1281_v54 = vpop.permute.xlu1 %310 }
  0xac   :  { %v1256_v49 = vsub.f32 %v1166_v17, %v163_v48  ;;  %v1283_v55 = vpop.permute.xlu2 %334 }
  0xae   :  { %350 = vperm.xlu0 %994, %v1151_v14   ;;  %242 = vrot.lane.b32.xlu1 %v1256_v49, %s1036_s3 }
  0xaf   :  { %238 = vrot.lane.b32.xlu2 %v1253_v47, %s1036_s3 }
  0xb3   :  { %v1288_v56 = vpop.permute.xlu0 %306  ;;  %v1290_v57 = vpop.permute.xlu1 %318 }
  0xb4   :  { %v1294_v59 = vpop.permute.xlu2 %346 }
  0xb6   :  { %362 = vperm.xlu0 %994, %v1166_v17   ;;  %354 = vperm.xlu1 %995, %v1154_v15  }
  0xb7   :  { %358 = vperm.xlu2 %993, %v1157_v16  }
  0xbb   :  { %v1297_v60 = vpop.permute.xlu0 %326  ;;  %v1299_v61 = vpop.permute.xlu1 %330 }
  0xbe   :  { %998 = vset.pattern.permute.xlu0 %v1037_v51  ;;  %996 = vset.pattern.permute.xlu1 %v1037_v51 }
  0xbf   :  { %997 = vset.pattern.permute.xlu2 %v1037_v51  ;;  %391 = vperm.xlu0 %998, %v1091_v1  }
  0xc0   :  { %387 = vperm.xlu2 %997, %v1109_v5   ;;  %383 = vperm.xlu1 %996, %v1094_v2  }
  0xc3   :  { %v1306_v63 = vpop.permute.xlu0 %338  ;;  %v1308_v0 = vpop.permute.xlu1 %342 }
  0xc7   :  { %411 = vperm.xlu0 %998, %v1124_v9  }
  0xc8   :  { %399 = vperm.xlu2 %997, %v1101_v3   ;;  %395 = vperm.xlu1 %996, %v1106_v4  }
  0xcf   :  { %423 = vperm.xlu0 %998, %v1139_v12  }
  0xd0   :  { %407 = vperm.xlu2 %997, %v1121_v8   ;;  %403 = vperm.xlu1 %996, %v1112_v6  }
  0xd7   :  { %435 = vperm.xlu0 %998, %v1154_v15  }
  0xd8   :  { %419 = vperm.xlu2 %997, %v1136_v11   ;;  %415 = vperm.xlu1 %996, %v1127_v10  }
  0xdf   :  { %1002 = vset.pattern.permute.xlu0 %v1038_v58 }
  0xe0   :  { %431 = vperm.xlu2 %997, %v1151_v14   ;;  %427 = vperm.xlu1 %996, %v1142_v13  }
  0xe1   :  { %549 = vperm.xlu0 %1002, %v1109_v5  }
  0xe8   :  { %443 = vperm.xlu2 %997, %v1166_v17   ;;  %439 = vperm.xlu1 %996, %v1157_v16  }
  0xe9   :  { %569 = vperm.xlu0 %1002, %v1121_v8   ;;  %v1304_v62 = vpop.permute.xlu2 %214 }
  0xf0   :  { %1000 = vset.pattern.permute.xlu2 %v1770_v7  ;;  %999 = vset.pattern.permute.xlu1 %v1770_v7 }
  0xf1   :  { %581 = vperm.xlu0 %1002, %v1136_v11   ;;  %472 = vperm.xlu2 %1000, %v1091_v1   ;;  %v1314_v18 = vpop.permute.xlu2 %220 }
  0xf2   :  { %468 = vperm.xlu1 %999, %v1109_v5  }
  0xf8   :  { %v1317_v19 = vpop.permute.xlu1 %212  ;;  %v217_v20 = vpop.permute.xlu0 %216 }
  0xf9   :  { %593 = vperm.xlu0 %1002, %v1151_v14   ;;  %480 = vperm.xlu2 %1000, %v1101_v3   ;;  %v227_v21 = vpop.permute.xlu2 %226  ;;  %v262_v51 = vmul.f32 %v217_v20, %v1183_v22 }
  0xfa   :  { %476 = vperm.xlu1 %999, %v1106_v4  }
 0x100   :  { %v1322_v25 = vpop.permute.xlu1 %218  ;;  %v1324_v26 = vpop.permute.xlu0 %222 }
 0x101   :  { %605 = vperm.xlu0 %1002, %v1166_v17   ;;  %492 = vperm.xlu2 %1000, %v1124_v9   ;;  %v233_v27 = vpop.permute.xlu2 %232 }
 0x102   :  { %488 = vperm.xlu1 %999, %v1121_v8   ;;  %v270_v20 = vmul.f32 %v233_v27, %v1241_v43 }
 0x108   :  { %v1329_v5 = vpop.permute.xlu1 %224  ;;  %v1331_v32 = vpop.permute.xlu0 %228 }
 0x109   :  { %1004 = vset.pattern.permute.xlu0 %v1770_v7  ;;  %504 = vperm.xlu2 %1000, %v1139_v12   ;;  %v239_v34 = vpop.permute.xlu2 %238 }
 0x10a   :  { %500 = vperm.xlu1 %999, %v1136_v11   ;;  %464 = vperm.xlu0 %1004, %v1094_v2  }
 0x110   :  { %v1337_v35 = vpop.permute.xlu1 %230  ;;  %v1339_v38 = vpop.permute.xlu0 %234 }
 0x111   :  { %516 = vperm.xlu2 %1000, %v1154_v15   ;;  %v1342_v8 = vpop.permute.xlu2 %358 }
 0x112   :  { %1772 = vst [vmem:[#allocation8_spill] sm:$0xff] %v1342_v8  ;;  %512 = vperm.xlu1 %999, %v1151_v14   ;;  %484 = vperm.xlu0 %1004, %v1112_v6  }
 0x118   :  { %v1346_v40 = vpop.permute.xlu1 %236  ;;  %v1348_v41 = vpop.permute.xlu0 %240 }
 0x119   :  { %1001 = vset.pattern.permute.xlu2 %v1038_v58 }
 0x11a   :  { %524 = vperm.xlu1 %999, %v1166_v17   ;;  %496 = vperm.xlu0 %1004, %v1127_v10   ;;  %v1352_v11 = vpop.permute.xlu2 %387 }
 0x11b   :  { %545 = vperm.xlu2 %1001, %v1094_v2  }
 0x120   :  { %v1355_v44 = vpop.permute.xlu1 %242  ;;  %v1357_v46 = vpop.permute.xlu0 %350 }
 0x122   :  { %1003 = vset.pattern.permute.xlu1 %v1038_v58  ;;  %508 = vperm.xlu0 %1004, %v1142_v13   ;;  %v1360_v14 = vpop.permute.xlu2 %399  ;;  %v278_v58 = vmul.f32 0.7, %v262_v51 }
 0x123   :  { %1773 = vst [vmem:[#allocation9_spill] sm:$0xff] %v1360_v14  ;;  %557 = vperm.xlu2 %1001, %v1106_v4   ;;  %553 = vperm.xlu1 %1003, %v1091_v1   ;;  %v267_v14 = vmul.f32 %v227_v21, %v1226_v37  ;;  %v273_v21 = vmul.f32 %v239_v34, %v1253_v47  ;;  %v1774_v34 = vmov 2  }
 0x125   :  { %v283_v8 = vmul.f32 0.7, %v267_v14  ;;  %v289_v27 = vmul.f32 0.7, %v273_v21 }
 0x128   :  { %v1364_v17 = vpop.permute.xlu1 %354  ;;  %v1366_v48 = vpop.permute.xlu0 %362 }
 0x12a   :  { %520 = vperm.xlu0 %1004, %v1157_v16   ;;  %v1369_v2 = vpop.permute.xlu2 %407 }
 0x12b   :  { %565 = vperm.xlu2 %1001, %v1112_v6   ;;  %561 = vperm.xlu1 %1003, %v1101_v3  }
 0x131   :  { %v1374_v7 = vpop.permute.xlu0 %391 }
 0x132   :  { %v1376_v4 = vpop.permute.xlu2 %419  ;;  %v1378_v1 = vpop.permute.xlu1 %383  ;;  %733 = vperm.xlu0 %1004, %v278_v58  }
 0x133   :  { %577 = vperm.xlu2 %1001, %v1127_v10   ;;  %573 = vperm.xlu1 %1003, %v1124_v9   ;;  %v286_v10 = vmul.f32 0.7, %v270_v20  ;;  %v263_v20 = vmul.f32 %v1322_v25, %v1196_v28 }
 0x139   :  { %v1383_v6 = vpop.permute.xlu0 %411 }
 0x13a   :  { %v1385_v3 = vpop.permute.xlu2 %431  ;;  %v1387_v22 = vpop.permute.xlu1 %395  ;;  %758 = vperm.xlu0 %1004, %v283_v8   ;;  %v1402_v8 = vld [vmem:[%s1085_s28] sm:$0xf] }
 0x13b   :  { %589 = vperm.xlu2 %1001, %v1142_v13   ;;  %585 = vperm.xlu1 %1003, %v1139_v12   ;;  %v261_v12 = vmul.f32 %v1304_v62, %v1199_v29  ;;  %v260_v13 = vmul.f32 %v1317_v19, %v1186_v23  ;;  %v1409_v43 = vperm.slane %v1402_v8, 0  ;;  %v1412_v14 = vperm.slane %v1402_v8, 2 }
 0x13c   :  { %v264_v19 = vmul.f32 %v1314_v18, %v1211_v31  ;;  %v1430_v21 = vperm.slane %v1402_v8, 1 }
 0x13d   :  { %v276_v58 = vmul.f32 0.7, %v260_v13  ;;  %v368_v23 = vmax.f32 %v1281_v54, %v1409_v43  ;;  %v279_v54 = vmul.f32 0.7, %v263_v20 }
 0x13e   :  { %v280_v13 = vmul.f32 0.7, %v264_v19  ;;  %v448_v28 = vmax.f32 %v1352_v11, %v1430_v21  ;;  %v373_v11 = vmax.f32 %v1299_v61, %v1409_v43 }
 0x141   :  { %v1392_v51 = vpop.permute.xlu0 %423 }
 0x142   :  { %v1394_v9 = vpop.permute.xlu2 %443  ;;  %v1396_v37 = vpop.permute.xlu1 %403  ;;  %773 = vperm.xlu0 %1004, %v286_v10  }
 0x143   :  { %601 = vperm.xlu2 %1001, %v1157_v16   ;;  %597 = vperm.xlu1 %1003, %v1154_v15   ;;  %v277_v15 = vmul.f32 0.7, %v261_v12  ;;  %v1433_v12 = vperm.slane %v1402_v8, 3 }
 0x149   :  { %v1414_v16 = vpop.permute.xlu0 %435 }
 0x14a   :  { %v1416_v47 = vpop.permute.xlu1 %415  ;;  %788 = vperm.xlu0 %1004, %v289_v27  }
 0x14b   :  { %1006 = vset.pattern.permute.xlu2 %v1774_v34  ;;  %1005 = vset.pattern.permute.xlu1 %v1774_v34  ;;  %v473_v29 = vpop.permute.xlu2 %472  ;;  %v265_v34 = vmul.f32 %v1324_v26, %v1193_v24  ;;  %v268_v26 = vmul.f32 %v1331_v32, %v1208_v30  ;;  %v367_v32 = vmax.f32 %v1288_v56, %v1409_v43 }
 0x14c   :  { %728 = vperm.xlu2 %1006, %v277_v15   ;;  %v530_v62 = vmin.f32 %v473_v29, %v1412_v14  ;;  %723 = vperm.xlu1 %1005, %v276_v58   ;;  %v370_v15 = vmax.f32 %v1290_v57, %v1409_v43  ;;  %v266_v29 = vmul.f32 %v1329_v5, %v1214_v33 }
 0x14d   :  { %v269_v5 = vmul.f32 %v1337_v35, %v1229_v39 }
 0x14e   :  { %v1427_v10 = vsub.f32 %v530_v62, %v368_v23  ;;  %v281_v62 = vmul.f32 0.7, %v265_v34  ;;  %v282_v19 = vmul.f32 0.7, %v266_v29  ;;  %v456_v34 = vmax.f32 %v1376_v4, %v1430_v21 }
 0x152   :  { %v1435_v27 = vpop.permute.xlu1 %427 }
 0x153   :  { %v481_v58 = vpop.permute.xlu2 %480  ;;  %v550_v31 = vpop.permute.xlu0 %549 }
 0x154   :  { %743 = vperm.xlu2 %1006, %v280_v13   ;;  %v532_v18 = vmin.f32 %v481_v58, %v1412_v14  ;;  %738 = vperm.xlu1 %1005, %v279_v54   ;;  %v610_v25 = vmin.f32 %v550_v31, %v1433_v12  ;;  %v453_v58 = vmax.f32 %v1369_v2, %v1430_v21  ;;  %v284_v31 = vmul.f32 0.7, %v268_v26 }
 0x155   :  { %v376_v2 = vmax.f32 %v1308_v0, %v1409_v43  ;;  %v271_v0 = vmul.f32 %v1339_v38, %v1223_v36  ;;  %v459_v36 = vmax.f32 %v1385_v3, %v1430_v21 }
 0x156   :  { %v1447_v23 = vsub.f32 %v532_v18, %v370_v15  ;;  %v658_v57 = vsub.f32 %v610_v25, %v448_v28  ;;  %v285_v28 = vmul.f32 0.7, %v269_v5 }
 0x15a   :  { %v1449_v20 = vpop.permute.xlu1 %439 }
 0x15b   :  { %v493_v13 = vpop.permute.xlu2 %492  ;;  %v570_v54 = vpop.permute.xlu0 %569 }
 0x15c   :  { %v535_v24 = vmin.f32 %v493_v13, %v1412_v14  ;;  %753 = vperm.xlu2 %1006, %v282_v19   ;;  %748 = vperm.xlu1 %1005, %v281_v62   ;;  %v615_v33 = vmin.f32 %v570_v54, %v1433_v12  ;;  %v272_v62 = vmul.f32 %v1346_v40, %v1244_v45  ;;  %v674_v13 = vmax.f32 %v658_v57, 0.0 }
 0x15d   :  { %v369_v57 = vmax.f32 %v1271_v52, %v1409_v43 }
 0x15e   :  { %v1461_v15 = vsub.f32 %v535_v24, %v373_v11  ;;  %v663_v61 = vsub.f32 %v615_v33, %v453_v58  ;;  %v287_v58 = vmul.f32 0.7, %v271_v0  ;;  %v288_v24 = vmul.f32 0.7, %v272_v62 }
 0x15f   :  { %v379_v33 = vmax.f32 %v1364_v17, %v1409_v43  ;;  %v274_v17 = vmul.f32 %v1348_v41, %v1238_v42  ;;  %v372_v42 = vmax.f32 %v1297_v60, %v1409_v43  ;;  %v366_v60 = vmax.f32 %v1266_v50, %v1409_v43 }
 0x160   :  { %v679_v62 = vmax.f32 %v663_v61, 0.0 }
 0x163   :  { %v505_v18 = vpop.permute.xlu2 %504  ;;  %v582_v25 = vpop.permute.xlu0 %581 }
 0x164   :  { %v538_v29 = vmin.f32 %v505_v18, %v1412_v14  ;;  %768 = vperm.xlu2 %1006, %v285_v28   ;;  %v469_v30 = vpop.permute.xlu1 %468  ;;  %763 = vperm.xlu1 %1005, %v284_v31   ;;  %v618_v39 = vmin.f32 %v582_v25, %v1433_v12  ;;  %v275_v28 = vmul.f32 %v1355_v44, %v1256_v49  ;;  %v290_v25 = vmul.f32 0.7, %v274_v17 }
 0x165   :  { %v529_v35 = vmin.f32 %v469_v30, %v1412_v14  ;;  %v462_v30 = vmax.f32 %v1394_v9, %v1430_v21  ;;  %v447_v44 = vmax.f32 %v1378_v1, %v1430_v21 }
 0x166   :  { %v1476_v19 = vsub.f32 %v538_v29, %v376_v2  ;;  %v666_v4 = vsub.f32 %v618_v39, %v456_v34  ;;  %v291_v34 = vmul.f32 0.7, %v275_v28 }
 0x167   :  { %v626_v11 = vsub.f32 %v529_v35, %v367_v32 }
 0x169   :  { %v642_v54 = vmax.f32 %v626_v11, 0.0 }
 0x16b   :  { %v517_v56 = vpop.permute.xlu2 %516  ;;  %v594_v26 = vpop.permute.xlu0 %593  ;;  %v1480_v5 = vmul.f32 %v674_v13, %v642_v54 }
 0x16c   :  { %v541_v45 = vmin.f32 %v517_v56, %v1412_v14  ;;  %783 = vperm.xlu2 %1006, %v288_v24   ;;  %v477_v38 = vpop.permute.xlu1 %476  ;;  %778 = vperm.xlu1 %1005, %v287_v58   ;;  %v621_v40 = vmin.f32 %v594_v26, %v1433_v12  ;;  %v375_v24 = vmax.f32 %v1306_v63, %v1409_v43 }
 0x16d   :  { %v531_v31 = vmin.f32 %v477_v38, %v1412_v14  ;;  %v450_v26 = vmax.f32 %v1387_v22, %v1430_v21  ;;  %v371_v22 = vmax.f32 %v1276_v53, %v1409_v43 }
 0x16e   :  { %v1493_v2 = vsub.f32 %v541_v45, %v379_v33  ;;  %v669_v3 = vsub.f32 %v621_v40, %v459_v36  ;;  %v682_v40 = vmax.f32 %v666_v4, 0.0 }
 0x16f   :  { %v628_v18 = vsub.f32 %v531_v31, %v369_v57 }
 0x171   :  { %v644_v17 = vmax.f32 %v628_v18, 0.0 }
 0x173   :  { %v606_v29 = vpop.permute.xlu0 %605 }
 0x174   :  { %798 = vperm.xlu2 %1006, %v291_v34   ;;  %v489_v52 = vpop.permute.xlu1 %488  ;;  %793 = vperm.xlu1 %1005, %v290_v25   ;;  %v624_v39 = vmin.f32 %v606_v29, %v1433_v12 }
 0x175   :  { %v534_v49 = vmin.f32 %v489_v52, %v1412_v14  ;;  %v546_v41 = vpop.permute.xlu2 %545  ;;  %v378_v52 = vmax.f32 %v1357_v46, %v1409_v43 }
 0x176   :  { %v1503_v32 = vsub.f32 %v624_v39, %v462_v30  ;;  %v609_v35 = vmin.f32 %v546_v41, %v1433_v12 }
 0x177   :  { %v631_v0 = vsub.f32 %v534_v49, %v372_v42  ;;  %v452_v42 = vmax.f32 %v1396_v37, %v1430_v21  ;;  %v381_v37 = vmax.f32 %v1366_v48, %v1409_v43 }
 0x178   :  { %v657_v9 = vsub.f32 %v609_v35, %v447_v44 }
 0x179   :  { %v647_v11 = vmax.f32 %v631_v0, 0.0  ;;  %v685_v0 = vmax.f32 %v669_v3, 0.0 }
 0x17a   :  { %v673_v57 = vmax.f32 %v657_v9, 0.0 }
 0x17b   :  { %v1506_v13 = vmul.f32 %v679_v62, %v647_v11 }
 0x17c   :  { %v501_v54 = vpop.permute.xlu1 %500  ;;  %v465_v58 = vpop.permute.xlu0 %464 }
 0x17d   :  { %v537_v1 = vmin.f32 %v501_v54, %v1412_v14  ;;  %v558_v33 = vpop.permute.xlu2 %557  ;;  %v528_v56 = vmin.f32 %v465_v58, %v1412_v14 }
 0x17e   :  { %v612_v61 = vmin.f32 %v558_v33, %v1433_v12  ;;  %v455_v33 = vmax.f32 %v1416_v47, %v1430_v21 }
 0x17f   :  { %v634_v36 = vsub.f32 %v537_v1, %v375_v24  ;;  %v625_v45 = vsub.f32 %v528_v56, %v366_v60  ;;  %v374_v60 = vmax.f32 %v1283_v55, %v1409_v43 }
 0x180   :  { %v660_v38 = vsub.f32 %v612_v61, %v450_v26 }
 0x181   :  { %v650_v31 = vmax.f32 %v634_v36, 0.0  ;;  %v641_v50 = vmax.f32 %v625_v45, 0.0  ;;  %v688_v45 = vmax.f32 %v1503_v32, 0.0  ;;  %v458_v32 = vmax.f32 %v1435_v27, %v1430_v21  ;;  %v1775_v27 = vld [vmem:[#allocation8_spill] sm:$0xff] }
 0x182   :  { %v676_v28 = vmax.f32 %v660_v38, 0.0 }
 0x183   :  { %v1517_v63 = vmul.f32 %v682_v40, %v650_v31  ;;  %v1519_v25 = vmul.f32 %v673_v57, %v641_v50  ;;  %v377_v50 = vmax.f32 %v1294_v59, %v1409_v43  ;;  %v293_v59 = vrot.slane %v1402_v8, 6 }
 0x184   :  { %v513_v34 = vpop.permute.xlu1 %512  ;;  %v485_v29 = vpop.permute.xlu0 %484  ;;  %v1521_v30 = vmul.f32 %v676_v28, %v644_v17 }
 0x185   :  { %v540_v4 = vmin.f32 %v513_v34, %v1412_v14  ;;  %v566_v39 = vpop.permute.xlu2 %565  ;;  %v533_v18 = vmin.f32 %v485_v29, %v1412_v14  ;;  %v449_v34 = vmax.f32 %v1374_v7, %v1430_v21 }
 0x186   :  { %v614_v49 = vmin.f32 %v566_v39, %v1433_v12 }
 0x187   :  { %v637_v41 = vsub.f32 %v540_v4, %v378_v52  ;;  %v630_v44 = vsub.f32 %v533_v18, %v371_v22 }
 0x188   :  { %v662_v35 = vsub.f32 %v614_v49, %v452_v42  ;;  %v643_v42 = vmax.f32 %v1427_v10, 0.0  ;;  %v461_v10 = vmax.f32 %v1449_v20, %v1430_v21 }
 0x189   :  { %v653_v9 = vmax.f32 %v637_v41, 0.0  ;;  %v646_v62 = vmax.f32 %v630_v44, 0.0 }
 0x18a   :  { %v678_v53 = vmax.f32 %v662_v35, 0.0 }
 0x18b   :  { %v1532_v11 = vmul.f32 %v685_v0, %v653_v9  ;;  %v380_v0 = vmax.f32 %v1775_v27, %v1409_v43  ;;  %v651_v27 = vmax.f32 %v1476_v19, 0.0 }
 0x18c   :  { %v525_v46 = vpop.permute.xlu1 %524  ;;  %v497_v54 = vpop.permute.xlu0 %496  ;;  %v1534_v58 = vmul.f32 %v678_v53, %v646_v62 }
 0x18d   :  { %v543_v24 = vmin.f32 %v525_v46, %v1412_v14  ;;  %v578_v1 = vpop.permute.xlu2 %577  ;;  %v536_v3 = vmin.f32 %v497_v54, %v1412_v14  ;;  %v295_v46 = vsub.f32 %v1402_v8, %v293_v59  ;;  %v1776_v54 = vld [vmem:[#allocation9_spill] sm:$0xff]  ;;  %v871_v59 = vstv %s870_s7 }
 0x18e   :  { %v617_v56 = vmin.f32 %v578_v1, %v1433_v12  ;;  %vm1607_vm1 = vcmp.eq.s32.totalorder %v871_v59, 1 }
 0x18f   :  { %v640_v26 = vsub.f32 %v543_v24, %v381_v37  ;;  %v633_v61 = vsub.f32 %v536_v3, %v374_v60  ;;  %v451_v60 = vmax.f32 %v1776_v54, %v1430_v21  ;;  %v460_v54 = vmax.f32 %v1414_v16, %v1430_v21 }
 0x190   :  { %v665_v36 = vsub.f32 %v617_v56, %v455_v33  ;;  %v297_v56 = vrot.slane %v295_v46, 1  ;;  %v654_v16 = vmax.f32 %v1493_v2, 0.0 }
 0x191   :  { %v656_v38 = vmax.f32 %v640_v26, 0.0  ;;  %v649_v55 = vmax.f32 %v633_v61, 0.0 }
 0x192   :  { %v681_v40 = vmax.f32 %v665_v36, 0.0 }
 0x193   :  { %v1546_v57 = vmul.f32 %v688_v45, %v656_v38  ;;  %v299_v38 = vmul.f32 %v297_v56, %v295_v46 }
 0x194   :  { %v509_v48 = vpop.permute.xlu0 %508  ;;  %v1548_v31 = vmul.f32 %v681_v40, %v649_v55  ;;  %v454_v55 = vmax.f32 %v1383_v6, %v1430_v21 }
 0x195   :  { %v590_v17 = vpop.permute.xlu2 %589  ;;  %v554_v47 = vpop.permute.xlu1 %553  ;;  %v539_v28 = vmin.f32 %v509_v48, %v1412_v14  ;;  %v834_v48 = vlaneseq }
 0x196   :  { %v620_v29 = vmin.f32 %v590_v17, %v1433_v12  ;;  %v611_v22 = vmin.f32 %v554_v47, %v1433_v12  ;;  %v300_v17 = vmul.f32 0.7, %v299_v38  ;;  %v648_v47 = vmax.f32 %v1461_v15, 0.0 }
 0x197   :  { %v636_v52 = vsub.f32 %v539_v28, %v377_v50  ;;  %v705_v38 = vmul.f32 1.7, %v1519_v25 }
 0x198   :  { %v668_v4 = vsub.f32 %v620_v29, %v458_v32  ;;  %v659_v39 = vsub.f32 %v611_v22, %v449_v34  ;;  %v1588_v34 = vshrl.u32 %v834_v48, 7  ;;  %v1594_v29 = vperm.slane %v300_v17, 2 }
 0x199   :  { %v652_v18 = vmax.f32 %v636_v52, 0.0  ;;  %v457_v52 = vmax.f32 %v1392_v51, %v1430_v21  ;;  %v943_v51 = vld [vmem:[#allocation5] sm:$0x1] }
 0x19a   :  { %v684_v49 = vmax.f32 %v668_v4, 0.0  ;;  %v675_v41 = vmax.f32 %v659_v39, 0.0  ;;  %v837_v4 = vadd.s32 16, %v1588_v34  ;;  %v1599_v39 = vand.u32 127, %v834_v48 }
 0x19c   :  { %v521_v44 = vpop.permute.xlu0 %520  ;;  %v691_v35 = vmul.f32 %v675_v41, %v643_v42  ;;  %v1561_v7 = vmul.f32 %v684_v49, %v652_v18  ;;  %v845_v42 = vadd.s32 80, %v1588_v34  ;;  %v841_v41 = vadd.s32 48, %v1588_v34 }
 0x19d   :  { %v602_v9 = vpop.permute.xlu2 %601  ;;  %v562_v62 = vpop.permute.xlu1 %561  ;;  %v542_v53 = vmin.f32 %v521_v44, %v1412_v14  ;;  %v645_v14 = vmax.f32 %v1447_v23, 0.0  ;;  %vm856_vm0 = vcmp.lt.s32.totalorder %v837_v4, %v1599_v39  ;;  %vm854_vm14 = vcmp.lt.s32.totalorder %v1588_v34, %v1599_v39 }
 0x19e   :  { %v623_v37 = vmin.f32 %v602_v9, %v1433_v12  ;;  %v613_v24 = vmin.f32 %v562_v62, %v1433_v12  ;;  %v707_v9 = vmul.f32 1.7, %v691_v35  ;;  %vm864_vm2 = vcmp.lt.s32.totalorder %v845_v42, %v1599_v39  ;;  %vm875_vm4 = vmor %vm1607_vm1, %vm856_vm0 }
 0x19f   :  { %v639_v1 = vsub.f32 %v542_v53, %v380_v0  ;;  %vm860_vm3 = vcmp.lt.s32.totalorder %v841_v41, %v1599_v39  ;;  %vm883_vm6 = vmor %vm1607_vm1, %vm864_vm2  ;;  %v844_v4 = vadd.s32 72, %v1588_v34  ;;  %v706_v42 = vmul.f32 1.7, %v1480_v5 }
 0x1a0   :  { %v671_v3 = vsub.f32 %v623_v37, %v461_v10  ;;  %v661_v43 = vsub.f32 %v613_v24, %v451_v60  ;;  %v839_v37 = vadd.s32 32, %v1588_v34  ;;  %vm879_vm7 = vmor %vm1607_vm1, %vm860_vm3  ;;  %v711_v24 = vmul.f32 1.7, %v1506_v13 }
 0x1a1   :  { %v655_v33 = vmax.f32 %v639_v1, 0.0  ;;  %vm873_vm2 = vmor %vm1607_vm1, %vm854_vm14 }
 0x1a2   :  { %v687_v26 = vmax.f32 %v671_v3, 0.0  ;;  %v677_v8 = vmax.f32 %v661_v43, 0.0  ;;  %v1040_v43 = vmov 0.0   ;;  %vm858_vm13 = vcmp.lt.s32.totalorder %v839_v37, %v1599_v39 }
 0x1a3   :  { %vm877_vm15 = vmor %vm1607_vm1, %vm858_vm13 }
 0x1a4   :  { %v734_v61 = vpop.permute.xlu0 %733  ;;  %v1574_v36 = vmul.f32 %v677_v8, %v645_v14  ;;  %v1576_v45 = vmul.f32 %v687_v26, %v655_v33 }
 0x1a5   :  { %v574_v20 = vpop.permute.xlu1 %573  ;;  %v804_v44 = vadd.f32 %v1594_v29, %v734_v61 }
 0x1a6   :  { %v616_v40 = vmin.f32 %v574_v20, %v1433_v12  ;;  %v1581_v50 = vpop.permute.xlu2 %728  ;;  %v709_v56 = vmul.f32 1.7, %v1574_v36  ;;  %v842_v20 = vadd.s32 56, %v1588_v34 }
 0x1a7   :  { %vm820_vm5 = vcmp.gt.f32.partialorder %v707_v9, %v804_v44  ;;  %v714_v44 = vmul.f32 1.7, %v1517_v63  ;;  %v847_v63 = vadd.s32 96, %v1588_v34 }
 0x1a8   :  { %v664_v23 = vsub.f32 %v616_v40, %v454_v55  ;;  %vm891_vm8 = vmand %vm820_vm5, %vm875_vm4  ;;  %v838_v55 = vadd.s32 24, %v1588_v34  ;;  %vm861_vm5 = vcmp.lt.s32.totalorder %v842_v20, %v1599_v39 }
 0x1a9   :  { %v907_v33 = vsel %vm891_vm8, 1.0, %v1040_v43  ;;  %vm880_vm8 = vmor %vm1607_vm1, %vm861_vm5 }
 0x1aa   :  { %v680_v28 = vmax.f32 %v664_v23, 0.0 }
 0x1ac   :  { %v1590_v32 = vmul.f32 %v680_v28, %v648_v47  ;;  %v1592_v6 = vpop.permute.xlu0 %758  ;;  %v836_v28 = vadd.s32 8, %v1588_v34 }
 0x1ad   :  { %v586_v22 = vpop.permute.xlu1 %585  ;;  %v809_v48 = vadd.f32 %v1594_v29, %v1592_v6  ;;  %v848_v6 = vadd.s32 104, %v1588_v34 }
 0x1ae   :  { %v619_v15 = vmin.f32 %v586_v22, %v1433_v12  ;;  %v744_v18 = vpop.permute.xlu2 %743  ;;  %v712_v40 = vmul.f32 1.7, %v1590_v32  ;;  %v708_v22 = vmul.f32 1.7, %v1521_v30  ;;  %vm855_vm13 = vcmp.lt.s32.totalorder %v836_v28, %v1599_v39 }
 0x1af   :  { %v806_v21 = vadd.f32 %v1594_v29, %v744_v18  ;;  %v803_v18 = vadd.f32 %v1594_v29, %v1581_v50  ;;  %vm867_vm14 = vcmp.lt.s32.totalorder %v848_v6, %v1599_v39 }
 0x1b0   :  { %v667_v49 = vsub.f32 %v619_v15, %v457_v52  ;;  %v840_v15 = vadd.s32 40, %v1588_v34  ;;  %vm1695_vm5 = vmor %vm1607_vm1, %vm867_vm14 }
 0x1b1   :  { %vm822_vm0 = vcmp.gt.f32.partialorder %v709_v56, %v806_v21 }
 0x1b2   :  { %v683_v0 = vmax.f32 %v667_v49, 0.0  ;;  %vm893_vm3 = vmand %vm822_vm0, %vm877_vm15  ;;  %vm863_vm0 = vcmp.lt.s32.totalorder %v844_v4, %v1599_v39 }
 0x1b3   :  { %v1650_v25 = vsel %vm893_vm3, 1.0, %v1040_v43  ;;  %vm859_vm3 = vcmp.lt.s32.totalorder %v840_v15, %v1599_v39 }
 0x1b4   :  { %v699_v62 = vmul.f32 %v683_v0, %v651_v27  ;;  %v774_v53 = vpop.permute.xlu0 %773 }
 0x1b5   :  { %v598_v46 = vpop.permute.xlu1 %597  ;;  %v812_v19 = vadd.f32 %v1594_v29, %v774_v53 }
 0x1b6   :  { %v622_v60 = vmin.f32 %v598_v46, %v1433_v12  ;;  %v715_v10 = vmul.f32 1.7, %v699_v62  ;;  %v754_v35 = vpop.permute.xlu2 %753  ;;  %v710_v46 = vmul.f32 1.7, %v1534_v58 }
 0x1b7   :  { %v808_v1 = vadd.f32 %v1594_v29, %v754_v35 }
 0x1b8   :  { %v670_v3 = vsub.f32 %v622_v60, %v460_v54  ;;  %vm828_vm9 = vcmp.gt.f32.partialorder %v715_v10, %v812_v19  ;;  %v843_v54 = vadd.s32 64, %v1588_v34  ;;  %v717_v10 = vmul.f32 1.7, %v1532_v11 }
 0x1b9   :  { %vm899_vm10 = vmand %vm828_vm9, %vm883_vm6  ;;  %vm824_vm11 = vcmp.gt.f32.partialorder %v711_v24, %v808_v1  ;;  %vm825_vm9 = vcmp.gt.f32.partialorder %v712_v40, %v809_v48  ;;  %v713_v11 = vmul.f32 1.7, %v1548_v31  ;;  %v849_v40 = vadd.s32 112, %v1588_v34 }
 0x1ba   :  { %v686_v12 = vmax.f32 %v670_v3, 0.0  ;;  %vm895_vm12 = vmand %vm824_vm11, %vm879_vm7  ;;  %v915_v8 = vsel %vm899_vm10, 1.0, %v1040_v43  ;;  %vm857_vm7 = vcmp.lt.s32.totalorder %v838_v55, %v1599_v39  ;;  %v850_v3 = vadd.s32 120, %v1588_v34 }
 0x1bb   :  { %v911_v13 = vsel %vm895_vm12, 1.0, %v1040_v43  ;;  %vm876_vm10 = vmor %vm1607_vm1, %vm857_vm7 }
 0x1bc   :  { %v923_v14 = vmax.f32 %v907_v33, %v911_v13  ;;  %v702_v26 = vmul.f32 %v686_v12, %v654_v16  ;;  %vm896_vm11 = vmand %vm825_vm9, %vm880_vm8  ;;  %v789_v59 = vpop.permute.xlu0 %788  ;;  %v846_v13 = vadd.s32 88, %v1588_v34  ;;  %v719_v34 = vmul.f32 1.7, %v1576_v45 }
 0x1bd   :  { %v1675_v49 = vsel %vm896_vm11, 1.0, %v1040_v43  ;;  %v815_v62 = vadd.f32 %v1594_v29, %v789_v59  ;;  %vm878_vm8 = vmor %vm1607_vm1, %vm859_vm3 }
 0x1be   :  { %v724_v2 = vpop.permute.xlu1 %723  ;;  %v1637_v61 = vmax.f32 %v923_v14, %v915_v8  ;;  %v769_v23 = vpop.permute.xlu2 %768  ;;  %v718_v0 = vmul.f32 1.7, %v702_v26  ;;  %v720_v8 = vmul.f32 1.7, %v1546_v57 }
 0x1bf   :  { %v802_v36 = vadd.f32 %v1594_v29, %v724_v2  ;;  %v811_v30 = vadd.f32 %v1594_v29, %v769_v23 }
 0x1c0   :  { %vm831_vm11 = vcmp.gt.f32.partialorder %v718_v0, %v815_v62 }
 0x1c1   :  { %vm818_vm4 = vcmp.gt.f32.partialorder %v705_v38, %v802_v36  ;;  %vm827_vm7 = vcmp.gt.f32.partialorder %v714_v44, %v811_v30  ;;  %v716_v36 = vmul.f32 1.7, %v1561_v7 }
 0x1c2   :  { %vm889_vm6 = vmand %vm818_vm4, %vm873_vm2  ;;  %vm819_vm4 = vcmp.gt.f32.partialorder %v706_v42, %v803_v18 }
 0x1c3   :  { %v1653_v17 = vsel %vm889_vm6, 1.0, %v1040_v43  ;;  %vm1683_vm2 = vmor %vm1607_vm1, %vm855_vm13  ;;  %vm866_vm13 = vcmp.lt.s32.totalorder %v847_v63, %v1599_v39 }
 0x1c4   :  { %v921_v47 = vmax.f32 %v1653_v17, %v1650_v25  ;;  %vm882_vm6 = vmor %vm1607_vm1, %vm863_vm0 }
 0x1c5   :  { %vm890_vm9 = vmand %vm819_vm4, %vm1683_vm2 }
 0x1c6   :  { %v739_v32 = vpop.permute.xlu1 %738  ;;  %v784_v27 = vpop.permute.xlu2 %783  ;;  %v906_v58 = vsel %vm890_vm9, 1.0, %v1040_v43  ;;  %vm902_vm0 = vmand %vm831_vm11, %vm1695_vm5  ;;  %vm865_vm9 = vcmp.lt.s32.totalorder %v846_v13, %v1599_v39 }
 0x1c7   :  { %v805_v52 = vadd.f32 %v1594_v29, %v739_v32  ;;  %v814_v60 = vadd.f32 %v1594_v29, %v784_v27  ;;  %vm885_vm2 = vmor %vm1607_vm1, %vm866_vm13  ;;  %v918_v33 = vsel %vm902_vm0, 1.0, %v1040_v43  ;;  %vm868_vm0 = vcmp.lt.s32.totalorder %v849_v40, %v1599_v39 }
 0x1c9   :  { %vm821_vm12 = vcmp.gt.f32.partialorder %v708_v22, %v805_v52  ;;  %vm830_vm3 = vcmp.gt.f32.partialorder %v717_v10, %v814_v60 }
 0x1ca   :  { %vm892_vm15 = vmand %vm821_vm12, %vm876_vm10 }
 0x1cb   :  { %v1679_v41 = vsel %vm892_vm15, 1.0, %v1040_v43  ;;  %vm898_vm12 = vmand %vm827_vm7, %vm882_vm6  ;;  %vm862_vm15 = vcmp.lt.s32.totalorder %v843_v54, %v1599_v39 }
 0x1cc   :  { %v924_v5 = vmax.f32 %v1679_v41, %v1675_v49  ;;  %v914_v24 = vsel %vm898_vm12, 1.0, %v1040_v43  ;;  %vm881_vm4 = vmor %vm1607_vm1, %vm862_vm15 }
 0x1cd   :  { %vm901_vm5 = vmand %vm830_vm3, %vm885_vm2 }
 0x1ce   :  { %v749_v53 = vpop.permute.xlu1 %748  ;;  %v799_v16 = vpop.permute.xlu2 %798  ;;  %v917_v2 = vsel %vm901_vm5, 1.0, %v1040_v43  ;;  %vm884_vm12 = vmor %vm1607_vm1, %vm865_vm9 }
 0x1cf   :  { %v807_v19 = vadd.f32 %v1594_v29, %v749_v53  ;;  %v817_v14 = vadd.f32 %v1594_v29, %v799_v16  ;;  %vm887_vm2 = vmor %vm1607_vm1, %vm868_vm0 }
 0x1d1   :  { %vm823_vm10 = vcmp.gt.f32.partialorder %v710_v46, %v807_v19  ;;  %vm833_vm11 = vcmp.gt.f32.partialorder %v720_v8, %v817_v14 }
 0x1d2   :  { %vm894_vm14 = vmand %vm823_vm10, %vm878_vm8  ;;  %vm869_vm8 = vcmp.lt.s32.totalorder %v850_v3, %v1599_v39 }
 0x1d3   :  { %v910_v35 = vsel %vm894_vm14, 1.0, %v1040_v43  ;;  %vm888_vm10 = vmor %vm1607_vm1, %vm869_vm8 }
 0x1d4   :  { %v922_v37 = vmax.f32 %v906_v58, %v910_v35  ;;  %vm904_vm13 = vmand %vm833_vm11, %vm888_vm10 }
 0x1d5   :  { %v920_v25 = vsel %vm904_vm13, 1.0, %v1040_v43 }
 0x1d6   :  { %v764_v1 = vpop.permute.xlu1 %763  ;;  %v926_v21 = vmax.f32 %v922_v37, %v914_v24 }
 0x1d7   :  { %v810_v12 = vadd.f32 %v1594_v29, %v764_v1 }
 0x1d8   :  { %v930_v56 = vmax.f32 %v926_v21, %v918_v33 }
 0x1d9   :  { %vm826_vm6 = vcmp.gt.f32.partialorder %v713_v11, %v810_v12 }
 0x1da   :  { %vm897_vm7 = vmand %vm826_vm6, %vm881_vm4 }
 0x1db   :  { %v913_v26 = vsel %vm897_vm7, 1.0, %v1040_v43 }
 0x1dc   :  { %v925_v31 = vmax.f32 %v921_v47, %v913_v26 }
 0x1de   :  { %v929_v20 = vmax.f32 %v925_v31, %v917_v2  ;;  %v779_v38 = vpop.permute.xlu1 %778 }
 0x1df   :  { %v813_v57 = vadd.f32 %v1594_v29, %v779_v38 }
 0x1e0   :  { %v933_v55 = vmax.f32 %v929_v20, %v930_v56 }
 0x1e1   :  { %vm829_vm14 = vcmp.gt.f32.partialorder %v716_v36, %v813_v57 }
 0x1e2   :  { %vm900_vm15 = vmand %vm829_vm14, %vm884_vm12 }
 0x1e3   :  { %v916_v48 = vsel %vm900_vm15, 1.0, %v1040_v43 }
 0x1e4   :  { %v928_v23 = vmax.f32 %v924_v5, %v916_v48 }
 0x1e6   :  { %v932_v17 = vmax.f32 %v928_v23, %v920_v25  ;;  %v794_v7 = vpop.permute.xlu1 %793 }
 0x1e7   :  { %v816_v47 = vadd.f32 %v1594_v29, %v794_v7 }
 0x1e9   :  { %vm832_vm3 = vcmp.gt.f32.partialorder %v719_v34, %v816_v47 }
 0x1ea   :  { %vm903_vm4 = vmand %vm832_vm3, %vm887_vm2 }
 0x1eb   :  { %v919_v28 = vsel %vm903_vm4, 1.0, %v1040_v43 }
 0x1ec   :  { %v931_v32 = vmax.f32 %v1637_v61, %v919_v28 }
 0x1ee   :  { %v934_v6 = vmax.f32 %v931_v32, %v932_v17 }
 0x1f0   :  { %v935_v22 = vmax.f32 %v933_v55, %v934_v6 }
 0x1f2   :  { %v936_v39 = vrot.slane %v935_v22, 4 }
 0x1f4   :  { %v937_v52 = vmax.f32 %v935_v22, %v936_v39 }
 0x1f6   :  { %v938_v4 = vrot.slane %v937_v52, 2 }
 0x1f8   :  { %v939_v15 = vmax.f32 %v937_v52, %v938_v4 }
 0x1fa   :  { %v940_v45 = vrot.slane %v939_v15, 1 }
 0x1fc   :  { %v941_v29 = vmax.f32 %v939_v15, %v940_v45 }
 0x1fe   :  { %vm942_vm1 = vcmp.gt.f32.partialorder %v941_v29, 0.0 }
 0x1ff   :  { %v944_v43 = vsel %vm942_vm1, 0, %v943_v51 }
 0x200   :  { %945 = vst [vmem:[#allocation5] sm:$0x1] %v944_v43 }
 0x201   :  { %1030 = shalt.err (!%p1027_p8)
}
 0x202   :  { %961 = dma.vmem_to_hbm [thread:$0]  %s957_s12, 16, %s959_s13, [#allocation6]  }
 0x203   :  { %1031 = dma.done.wait [#allocation6], 16  }
 0x204   :  { %1032 = vsyncadd [#allocation6], 4294967280 }
 0x205   :  { %966 = vsyncpa [#allocation6], 1 }

</bundles_post_ra>
